<compile_context>
chip_gen: v6e
topology: v6e:2x2x1
jax: 0.10.0
libtpu: 0.0.40
codegen_flags: <defaults>
</compile_context>

<pallas_src>
import functools

import jax
import jax.numpy as jnp
from jax.experimental import pallas as pl
from jax.experimental.pallas import tpu as pltpu

LANES = 128
SUBLANES = 8
MAX_BLOCK_ROWS = 2048          # (2048, 128) f32 block = 1 MiB per input stream


def _cross_loss_kernel(yt_ref, yp_ref, st_ref, out_ref, *,
                       smooth, total_rows, block_rows, blocks_per_par):
    i = pl.program_id(1)

    # Output block index depends only on the parallel axis -> it stays
    # resident across the inner ("arbitrary") axis and acts as accumulator.
    @pl.when(i == 0)
    def _():
        out_ref[...] = jnp.zeros_like(out_ref)

    yt = yt_ref[...].astype(jnp.float32)
    yp = yp_ref[...].astype(jnp.float32)
    st = st_ref[...].astype(jnp.float32)

    # Row-validity mask: the last block / last parallel chunk may overhang the
    # array; the overhang rows are clamped-DMA garbage and must not contribute.
    b = pl.program_id(0) * blocks_per_par + i                 # unclamped block index
    row_ids = b * block_rows + jax.lax.broadcasted_iota(
        jnp.int32, (block_rows, 1), 0)
    valid = row_ids < total_rows                              # (block_rows, 1)

    # st * (yt*log(yp+eps) + (1-yt)*log(1-yp+eps))
    #   == st * (yt*(log1 - log2) + log2)      (one fewer VPU multiply)
    log1 = jnp.log(yp + smooth)
    log2 = jnp.log(1.0 - yp + smooth)
    term = st * (yt * (log1 - log2) + log2)
    term = jnp.where(valid, term, 0.0)
    stv = jnp.where(valid, st, 0.0)

    # Fold block rows into (8, 128) partial sums with pure VPU adds (the
    # reshape is (8,128)-tile aligned, so it is layout-free).  The expensive
    # cross-lane/sublane reduction happens once, outside the kernel.
    folds = block_rows // SUBLANES
    out_ref[0, 0] += term.reshape(folds, SUBLANES, LANES).sum(axis=0)
    out_ref[0, 1] += stv.reshape(folds, SUBLANES, LANES).sum(axis=0)


def cross_loss_stenosis(y_true, y_pred, stenosis, *, smooth=1e-6):
    """Pallas implementation of cross_loss_stenosis.forward (PyTorch spec)."""
    n = int(y_true.size)

    # Lane-dense 2-D view with rows a multiple of 8.  A pad is only emitted
    # when numel is not already a multiple of 1024; zero pad is exact because
    # stenosis == 0 there.
    padded = pl.cdiv(n, SUBLANES * LANES) * (SUBLANES * LANES)
    rows = padded // LANES
    pad = padded - n

    def prep(x):
        x = jnp.ravel(x)
        if pad:
            x = jnp.pad(x, (0, pad))
        return x.reshape(rows, LANES)

    yt2, yp2, st2 = prep(y_true), prep(y_pred), prep(stenosis)

    block_rows = min(MAX_BLOCK_ROWS, rows)           # always a multiple of 8
    total_blocks = pl.cdiv(rows, block_rows)
    n_par = 2 if total_blocks >= 2 else 1            # v7x: one chunk per TensorCore
    blocks_per_par = pl.cdiv(total_blocks, n_par)

    def in_map(p, i):
        # Clamp so the DMA never addresses past the array; overhanging steps
        # are zeroed out by the in-kernel row mask.
        return (jnp.minimum(p * blocks_per_par + i, total_blocks - 1), 0)

    kernel = functools.partial(
        _cross_loss_kernel,
        smooth=float(smooth),
        total_rows=rows,
        block_rows=block_rows,
        blocks_per_par=blocks_per_par,
    )

    in_spec = pl.BlockSpec((block_rows, LANES), in_map)
    parts = pl.pallas_call(
        kernel,
        out_shape=jax.ShapeDtypeStruct((n_par, 2, SUBLANES, LANES), jnp.float32),
        grid_spec=pltpu.PrefetchScalarGridSpec(
            num_scalar_prefetch=0,
            grid=(n_par, blocks_per_par),
            in_specs=[in_spec, in_spec, in_spec],
            out_specs=pl.BlockSpec((1, 2, SUBLANES, LANES),
                                   lambda p, i: (p, 0, 0, 0)),
        ),
        compiler_params=pltpu.CompilerParams(
            dimension_semantics=("parallel", "arbitrary")),
    )(yt2, yp2, st2)

    # Tiny final combine in XLA: one cross-lane reduce over (n_par, 8, 128).
    num = jnp.sum(parts[:, 0])
    den = jnp.sum(parts[:, 1])
    return -num / (den + smooth)


def _reference(y_true, y_pred, stenosis):
    # Pure-JAX transcription of the PyTorch forward, for verification.
    smooth = 1e-6
    return -jnp.sum(
        stenosis * (y_true * jnp.log(y_pred + smooth)
                    + (1.0 - y_true) * jnp.log(1.0 - y_pred + smooth))
    ) / (jnp.sum(stenosis) + smooth)


if __name__ == "__main__":
    key = jax.random.PRNGKey(0)
    k1, k2, k3 = jax.random.split(key, 3)
    shape = (2, 4, 16, 16)  # NCHW

    y_pred = jax.nn.sigmoid(jax.random.normal(k1, shape, jnp.float32))
    y_true = (jax.random.uniform(k2, shape) > 0.5).astype(jnp.float32)
    stenosis = (jax.random.uniform(k3, shape) > 0.3).astype(jnp.float32)

    loss = cross_loss_stenosis(y_true, y_pred, stenosis)
    loss = jax.block_until_ready(loss)

    ref = _reference(y_true, y_pred, stenosis)
    assert jnp.isfinite(loss), "loss is not finite"
    assert abs(float(loss) - float(ref)) <= 1e-4 + 1e-4 * abs(float(ref)), (
        float(loss), float(ref))

    print("KERNEL_OK")
</pallas_src>

<mosaic_0001>
module attributes {stable_mosaic.version = 11 : i64} {
  func.func @_cross_loss_kernel(%arg0: i32, %arg1: i32, %arg2: memref<16x128xf32, #tpu.memory_space<vmem>>, %arg3: memref<16x128xf32, #tpu.memory_space<vmem>>, %arg4: memref<16x128xf32, #tpu.memory_space<vmem>>, %arg5: memref<1x2x8x128xf32, #tpu.memory_space<vmem>>) attributes {dimension_semantics = [#tpu.dimension_semantics<parallel>, #tpu.dimension_semantics<arbitrary>], iteration_bounds = array<i64: 1, 1>, scalar_prefetch = 0 : i64, scratch_operands = 0 : i64, tpu.core_type = #tpu.core_type<tc>, window_params = [{transform_indices = @transform_0, window_bounds = array<i64: 16, 128>}, {transform_indices = @transform_1, window_bounds = array<i64: 16, 128>}, {transform_indices = @transform_2, window_bounds = array<i64: 16, 128>}, {transform_indices = @transform_3, window_bounds = array<i64: 1, 2, 8, 128>}]} {
    %c0_i32 = arith.constant 0 : i32
    %0 = arith.cmpi eq, %arg1, %c0_i32 : i32
    %1 = arith.extui %0 : i1 to i32
    %c0_i32_0 = arith.constant 0 : i32
    %2 = arith.cmpi ne, %1, %c0_i32_0 : i32
    scf.if %2 {
      %cst_28 = arith.constant 0.000000e+00 : f32
      %50 = vector.broadcast %cst_28 : f32 to vector<1x2x8x128xf32>
      %c0_29 = arith.constant 0 : index
      %c0_30 = arith.constant 0 : index
      %c0_31 = arith.constant 0 : index
      %c0_32 = arith.constant 0 : index
      %51 = vector.load %arg5[%c0_29, %c0_30, %c0_31, %c0_32] : memref<1x2x8x128xf32, #tpu.memory_space<vmem>>, vector<1x2x8x128xf32>
      tpu.vector_store %arg5[%c0_29, %c0_30, %c0_31, %c0_32], %50 {strides = array<i32>} : memref<1x2x8x128xf32, #tpu.memory_space<vmem>>, vector<1x2x8x128xf32>,
    } else {
    }
    %c0 = arith.constant 0 : index
    %c0_1 = arith.constant 0 : index
    %3 = vector.load %arg2[%c0, %c0_1] : memref<16x128xf32, #tpu.memory_space<vmem>>, vector<16x128xf32>
    %c0_2 = arith.constant 0 : index
    %c0_3 = arith.constant 0 : index
    %4 = vector.load %arg3[%c0_2, %c0_3] : memref<16x128xf32, #tpu.memory_space<vmem>>, vector<16x128xf32>
    %c0_4 = arith.constant 0 : index
    %c0_5 = arith.constant 0 : index
    %5 = vector.load %arg4[%c0_4, %c0_5] : memref<16x128xf32, #tpu.memory_space<vmem>>, vector<16x128xf32>
    %c1_i32 = arith.constant 1 : i32
    %6 = arith.muli %arg0, %c1_i32 : i32
    %7 = arith.addi %6, %arg1 : i32
    %c16_i32 = arith.constant 16 : i32
    %8 = arith.muli %7, %c16_i32 : i32
    %9 = tpu.iota {dimensions = array<i32: 0>} : vector<16x1xi32>
    %10 = vector.broadcast %8 : i32 to vector<16x1xi32>
    %11 = arith.addi %10, %9 : vector<16x1xi32>
    %c16_i32_6 = arith.constant 16 : i32
    %12 = vector.broadcast %c16_i32_6 : i32 to vector<16x1xi32>
    %13 = arith.cmpi slt, %11, %12 : vector<16x1xi32>
    %cst = arith.constant 9.99999997E-7 : f32
    %14 = vector.broadcast %cst : f32 to vector<16x128xf32>
    %15 = arith.addf %4, %14 : vector<16x128xf32>
    %16 = math.log %15 : vector<16x128xf32>
    %cst_7 = arith.constant 1.000000e+00 : f32
    %17 = vector.broadcast %cst_7 : f32 to vector<16x128xf32>
    %18 = arith.subf %17, %4 : vector<16x128xf32>
    %cst_8 = arith.constant 9.99999997E-7 : f32
    %19 = vector.broadcast %cst_8 : f32 to vector<16x128xf32>
    %20 = arith.addf %18, %19 : vector<16x128xf32>
    %21 = math.log %20 : vector<16x128xf32>
    %22 = arith.subf %16, %21 : vector<16x128xf32>
    %23 = arith.mulf %3, %22 : vector<16x128xf32>
    %24 = arith.addf %23, %21 : vector<16x128xf32>
    %25 = arith.mulf %5, %24 : vector<16x128xf32>
    %cst_9 = arith.constant 0.000000e+00 : f32
    %26 = vector.shape_cast %13 : vector<16x1xi1> to vector<16x1xi1>
    %27 = vector.broadcast %26 : vector<16x1xi1> to vector<16x128xi1>
    %28 = vector.broadcast %cst_9 : f32 to vector<16x128xf32>
    %29 = arith.select %27, %25, %28 : vector<16x128xi1>, vector<16x128xf32>
    %cst_10 = arith.constant 0.000000e+00 : f32
    %30 = vector.shape_cast %13 : vector<16x1xi1> to vector<16x1xi1>
    %31 = vector.broadcast %30 : vector<16x1xi1> to vector<16x128xi1>
    %32 = vector.broadcast %cst_10 : f32 to vector<16x128xf32>
    %33 = arith.select %31, %5, %32 : vector<16x128xi1>, vector<16x128xf32>
    %c0_11 = arith.constant 0 : index
    %c0_12 = arith.constant 0 : index
    %c0_13 = arith.constant 0 : index
    %c0_14 = arith.constant 0 : index
    %34 = vector.load %arg5[%c0_11, %c0_12, %c0_13, %c0_14] : memref<1x2x8x128xf32, #tpu.memory_space<vmem>>, vector<1x1x8x128xf32>
    %35 = vector.shape_cast %34 : vector<1x1x8x128xf32> to vector<8x128xf32>
    %36 = vector.shape_cast %29 : vector<16x128xf32> to vector<2x8x128xf32>
    %cst_15 = arith.constant dense<0.000000e+00> : vector<8x128xf32>
    %37 = vector.multi_reduction <add>, %36, %cst_15 [0] : vector<2x8x128xf32> to vector<8x128xf32>
    %38 = arith.addf %35, %37 : vector<8x128xf32>
    %c0_16 = arith.constant 0 : index
    %c0_17 = arith.constant 0 : index
    %c0_18 = arith.constant 0 : index
    %c0_19 = arith.constant 0 : index
    %39 = vector.load %arg5[%c0_16, %c0_17, %c0_18, %c0_19] : memref<1x2x8x128xf32, #tpu.memory_space<vmem>>, vector<1x1x8x128xf32>
    %40 = vector.shape_cast %39 : vector<1x1x8x128xf32> to vector<8x128xf32>
    %41 = vector.shape_cast %38 : vector<8x128xf32> to vector<1x1x8x128xf32>
    tpu.vector_store %arg5[%c0_16, %c0_17, %c0_18, %c0_19], %41 {strides = array<i32>} : memref<1x2x8x128xf32, #tpu.memory_space<vmem>>, vector<1x1x8x128xf32>,
    %c0_20 = arith.constant 0 : index
    %c1 = arith.constant 1 : index
    %c0_21 = arith.constant 0 : index
    %c0_22 = arith.constant 0 : index
    %42 = vector.load %arg5[%c0_20, %c1, %c0_21, %c0_22] : memref<1x2x8x128xf32, #tpu.memory_space<vmem>>, vector<1x1x8x128xf32>
    %43 = vector.shape_cast %42 : vector<1x1x8x128xf32> to vector<8x128xf32>
    %44 = vector.shape_cast %33 : vector<16x128xf32> to vector<2x8x128xf32>
    %cst_23 = arith.constant dense<0.000000e+00> : vector<8x128xf32>
    %45 = vector.multi_reduction <add>, %44, %cst_23 [0] : vector<2x8x128xf32> to vector<8x128xf32>
    %46 = arith.addf %43, %45 : vector<8x128xf32>
    %c0_24 = arith.constant 0 : index
    %c1_25 = arith.constant 1 : index
    %c0_26 = arith.constant 0 : index
    %c0_27 = arith.constant 0 : index
    %47 = vector.load %arg5[%c0_24, %c1_25, %c0_26, %c0_27] : memref<1x2x8x128xf32, #tpu.memory_space<vmem>>, vector<1x1x8x128xf32>
    %48 = vector.shape_cast %47 : vector<1x1x8x128xf32> to vector<8x128xf32>
    %49 = vector.shape_cast %46 : vector<8x128xf32> to vector<1x1x8x128xf32>
    tpu.vector_store %arg5[%c0_24, %c1_25, %c0_26, %c0_27], %49 {strides = array<i32>} : memref<1x2x8x128xf32, #tpu.memory_space<vmem>>, vector<1x1x8x128xf32>,
    return
  }
  func.func @transform_0(%arg0: i32, %arg1: i32) -> (i32, i32) {
    %c1_i32 = arith.constant 1 : i32
    %0 = arith.muli %arg0, %c1_i32 : i32
    %1 = arith.addi %0, %arg1 : i32
    %c0_i32 = arith.constant 0 : i32
    %2 = arith.minsi %1, %c0_i32 : i32
    %c0_i32_0 = arith.constant 0 : i32
    %c0_i32_1 = arith.constant 0 : i32
    return %2, %c0_i32_0 : i32, i32
  }
  func.func @transform_1(%arg0: i32, %arg1: i32) -> (i32, i32) {
    %c1_i32 = arith.constant 1 : i32
    %0 = arith.muli %arg0, %c1_i32 : i32
    %1 = arith.addi %0, %arg1 : i32
    %c0_i32 = arith.constant 0 : i32
    %2 = arith.minsi %1, %c0_i32 : i32
    %c0_i32_0 = arith.constant 0 : i32
    %c0_i32_1 = arith.constant 0 : i32
    return %2, %c0_i32_0 : i32, i32
  }
  func.func @transform_2(%arg0: i32, %arg1: i32) -> (i32, i32) {
    %c1_i32 = arith.constant 1 : i32
    %0 = arith.muli %arg0, %c1_i32 : i32
    %1 = arith.addi %0, %arg1 : i32
    %c0_i32 = arith.constant 0 : i32
    %2 = arith.minsi %1, %c0_i32 : i32
    %c0_i32_0 = arith.constant 0 : i32
    %c0_i32_1 = arith.constant 0 : i32
    return %2, %c0_i32_0 : i32, i32
  }
  func.func @transform_3(%arg0: i32, %arg1: i32) -> (i32, i32, i32, i32) {
    %c0_i32 = arith.constant 0 : i32
    %c0_i32_0 = arith.constant 0 : i32
    %c0_i32_1 = arith.constant 0 : i32
    %c0_i32_2 = arith.constant 0 : i32
    return %arg0, %c0_i32, %c0_i32_0, %c0_i32_1 : i32, i32, i32, i32
  }
}

</mosaic_0001>

<bundles_post_ra>
// kernel: tpu_custom_call.1
= control target key start
LH: loop header
LB: loop body
LE: loop exit
PB: predicated region body
PF: predicated region fallthrough
CT: control target
= control target key end

     0   :  { %8 = vsyncpa [#allocation3], 0  ;;  %s322_s0 = inlined_call_operand.hbm [shape: f32[16,128], index: 0, kind: input, shape index: {}]   ;;  %s323_s1 = inlined_call_operand.hbm [shape: f32[16,128], index: 1, kind: input, shape index: {}]   ;;  %s324_s2 = inlined_call_operand.hbm [shape: f32[16,128], index: 2, kind: input, shape index: {}]   ;;  %s325_s3 = inlined_call_operand.hbm [shape: f32[1,2,8,128], index: 3, kind: output, shape index: {}]  }
   0x1   :  { %9 = vsyncpa [#allocation6], 0 }
   0x2   :  { %10 = vsyncpa [#allocation4], 0  ;;  %s272_s12 = smov [#allocation5]   ;;  %s273_s14 = smov [#allocation2]  }
   0x3   :  { %s40_s13 = sshll.u32 %s272_s12, 4  ;;  %s22_s15 = sshll.u32 %s273_s14, 4  ;;  %s41_s13 = int_to_ptr.vmem [resolvable:$true] %s40_s13  ;;  %s23_s15 = int_to_ptr.vmem [resolvable:$true] %s22_s15 }
   0x4   :  { %s194_s16 = scalar_lea.vmem %s41_s13, 256  ;;  %p199_p1 = scmp.lt.s32.totalorder %s41_s13, %s41_s13 }
   0x5   :  { %p195_p0 = scmp.ne.s32.totalorder %s41_s13, %s194_s16  ;;  %p200_p2 = scmp.lt.s32.totalorder %s194_s16, %s194_s16 }
   0x7   :  { %p201_p3 = por %p200_p2, %p199_p1 }
   0x9   :  { %p202_p4 = pnand %p201_p3, %p195_p0 }
   0xb   :  { %205 = shalt.err (!%p202_p4)
}
   0xc   :  { %s274_s17 = smov 128   ;;  %s275_s18 = smov 8  }
   0xd   :  { %46 = dma.hbm_to_vmem [thread:$0]  %s323_s1, 256, %s41_s13, [#allocation6], %s274_s17, %s274_s17, %s275_s18  }
   0xe   :  { %s214_s21 = scalar_lea.vmem %s23_s15, 256  ;;  %p219_p6 = scmp.lt.s32.totalorder %s23_s15, %s23_s15 }
   0xf   :  { %p215_p5 = scmp.ne.s32.totalorder %s23_s15, %s214_s21  ;;  %p220_p7 = scmp.lt.s32.totalorder %s214_s21, %s214_s21 }
  0x11   :  { %p221_p8 = por %p220_p7, %p219_p6 }
  0x13   :  { %p222_p9 = pnand %p221_p8, %p215_p5 }
  0x15   :  { %225 = shalt.err (!%p222_p9)
}
  0x16   :  { %28 = dma.hbm_to_vmem [thread:$0]  %s322_s0, 256, %s23_s15, [#allocation3], %s274_s17, %s274_s17, %s275_s18  }
  0x17   :  { %s276_s24 = smov [#allocation7]  }
  0x18   :  { %s58_s25 = sshll.u32 %s276_s24, 4  ;;  %s59_s25 = int_to_ptr.vmem [resolvable:$true] %s58_s25 }
  0x19   :  { %s234_s26 = scalar_lea.vmem %s59_s25, 256  ;;  %p239_p11 = scmp.lt.s32.totalorder %s59_s25, %s59_s25 }
  0x1a   :  { %p235_p10 = scmp.ne.s32.totalorder %s59_s25, %s234_s26  ;;  %p240_p12 = scmp.lt.s32.totalorder %s234_s26, %s234_s26 }
  0x1c   :  { %p241_p13 = por %p240_p12, %p239_p11 }
  0x1e   :  { %p242_p0 = pnand %p241_p13, %p235_p10 }
  0x20   :  { %245 = shalt.err (!%p242_p0)
}
  0x21   :  { %64 = dma.hbm_to_vmem [thread:$0]  %s324_s2, 256, %s59_s25, [#allocation6], %s274_s17, %s274_s17, %s275_s18  }
  0x22   :  { %266 = dma.done.wait [#allocation3], 256  }
  0x23   :  { %267 = vsyncadd [#allocation3], 4294967040 }
  0x24   :  { %268 = dma.done.wait [#allocation6], 512  }
  0x25   :  { %269 = vsyncadd [#allocation6], 4294966784  ;;  %v94_v0 = vld [vmem:[#allocation5] sm:$0xff]  ;;  %v95_v1 = vld [vmem:[#allocation5 + $0x8] sm:$0xff]  ;;  %s277_s0 = smov [#allocation8]  }
  0x26   :  { %v96_v2 = vld [vmem:[#allocation7] sm:$0xff]  ;;  %v97_v3 = vld [vmem:[#allocation7 + $0x8] sm:$0xff]  ;;  %v108_v4 = vadd.f32 1e-06, %v94_v0  ;;  %v114_v5 = vsub.f32 1.0, %v94_v0  ;;  %v115_v7 = vsub.f32 1.0, %v95_v1 }
  0x27   :  { %v109_v6 = vadd.f32 1e-06, %v95_v1  ;;  %v144_v8 = vadd.f32 %v97_v3, %v96_v2  ;;  %v92_v18 = vld [vmem:[#allocation2] sm:$0xff]  ;;  %v93_v20 = vld [vmem:[#allocation2 + $0x8] sm:$0xff]  ;;  %s152_s2 = sshll.u32 %s277_s0, 4  ;;  %s153_s2 = int_to_ptr.vmem [resolvable:$true] %s152_s2 }
  0x28   :  { %178 = vlog2.f32 %v108_v4  ;;  %v116_v9 = vadd.f32 1e-06, %v114_v5  ;;  %v117_v10 = vadd.f32 1e-06, %v115_v7  ;;  %s246_s28 = scalar_lea.vmem %s153_s2, 256  ;;  %p251_p2 = scmp.lt.s32.totalorder %s153_s2, %s153_s2 }
  0x29   :  { %180 = vlog2.f32 %v109_v6  ;;  %146 = vst [vmem:[#allocation8 + $0x8] sm:$0xff] %v144_v8  ;;  %p247_p1 = scmp.ne.s32.totalorder %s153_s2, %s246_s28  ;;  %p252_p3 = scmp.lt.s32.totalorder %s246_s28, %s246_s28 }
  0x2a   :  { %182 = vlog2.f32 %v116_v9 }
  0x2b   :  { %184 = vlog2.f32 %v117_v10  ;;  %p253_p4 = por %p252_p3, %p251_p2 }
  0x2d   :  { %p254_p5 = pnand %p253_p4, %p247_p1 }
  0x35   :  { %v179_v11 = vpop.eup %178 }
  0x36   :  { %v181_v12 = vpop.eup %180  ;;  %v111_v13 = vmul.f32 0.6931472, %v179_v11 }
  0x37   :  { %v183_v14 = vpop.eup %182  ;;  %v113_v15 = vmul.f32 0.6931472, %v181_v12 }
  0x38   :  { %v185_v16 = vpop.eup %184  ;;  %v119_v17 = vmul.f32 0.6931472, %v183_v14 }
  0x39   :  { %v121_v19 = vmul.f32 0.6931472, %v185_v16 }
  0x3a   :  { %v122_v21 = vsub.f32 %v111_v13, %v119_v17 }
  0x3b   :  { %v123_v22 = vsub.f32 %v113_v15, %v121_v19 }
  0x3c   :  { %v124_v23 = vmul.f32 %v122_v21, %v92_v18 }
  0x3d   :  { %v125_v24 = vmul.f32 %v123_v22, %v93_v20 }
  0x3e   :  { %v126_v25 = vadd.f32 %v124_v23, %v119_v17 }
  0x3f   :  { %v127_v26 = vadd.f32 %v125_v24, %v121_v19 }
  0x40   :  { %v128_v27 = vmul.f32 %v126_v25, %v96_v2 }
  0x41   :  { %v129_v28 = vmul.f32 %v127_v26, %v97_v3 }
  0x43   :  { %v139_v29 = vadd.f32 %v129_v28, %v128_v27 }
  0x45   :  { %141 = vst [vmem:[#allocation8] sm:$0xff] %v139_v29 }
  0x46   :  { %257 = shalt.err (!%p254_p5)
}
  0x47   :  { %158 = dma.vmem_to_hbm [thread:$0]  %s153_s2, 256, %s325_s3, [#allocation4], %s274_s17, %s274_s17, %s275_s18  }
  0x48   :  { %270 = dma.done.wait [#allocation4], 256  }
  0x49   :  { %271 = vsyncadd [#allocation4], 4294967040 }
  0x4a   :  { %162 = vsyncpa [#allocation3], 1 }
  0x4b   :  { %163 = vsyncpa [#allocation6], 1 }
  0x4c   :  { %164 = vsyncpa [#allocation4], 1 }

</bundles_post_ra>
